<compile_context>
chip_gen: v5e
topology: v5e:2x2
jax: 0.10.0
libtpu: 0.0.40
codegen_flags: <defaults>
</compile_context>

<pallas_src>
import functools

import jax
import jax.numpy as jnp
from jax.experimental import pallas as pl
from jax.experimental.pallas import tpu as pltpu

HIDDEN = 256
OUT_PAD = 128          # pad fc4 output to one full lane tile (lane-dense stores)
MAX_TILE_B = 1024      # per-step batch-tile cap (~4 MB/step footprint, well under
                       # the 32 MiB scoped VMEM limit even on v7x)


def _round_up(x, m):
    return (x + m - 1) // m * m


def _choose_tiling(batch):
    """Pick (tile_b, b_pad, num_tiles).

    - Large B: tiles up to MAX_TILE_B rows to amortize per-step overhead.
    - Mid B: force >= 2 grid steps so dimension_semantics=("parallel",) can
      shard the batch across v7x's two TensorCores.
    - Awkward B: tile_b = round_up(ceil(B / num_tiles), 16) minimizes padded
      rows instead of rounding B up to a fixed tile size.
    (16-row alignment covers bf16 sublane packing of the output tile.)
    """
    num_tiles = -(-batch // MAX_TILE_B)
    if num_tiles == 1 and batch > 16:
        num_tiles = 2                      # keep both v7x TensorCores busy
    tile_b = _round_up(-(-batch // num_tiles), 16)
    return tile_b, tile_b * num_tiles, num_tiles


def default_bf16_epilogue():
    try:
        kind = jax.devices()[0].device_kind.lower()
    except Exception:
        kind = ""
    # v5e has no bf16 VPU -- keep its inter-layer epilogue in f32.
    return "v5" not in kind


def dqn_kernel(x_ref,
               w1_ref, b1_ref,
               w2_ref, b2_ref,
               w3_ref, b3_ref,
               w4_ref, b4_ref,
               o_ref, *, bf16_epilogue):
    def hidden(h, w_ref, b_ref):
        acc = jnp.dot(h, w_ref[...], preferred_element_type=jnp.float32)
        if bf16_epilogue:
            # v6e/v7x: bias-add + ReLU on the native bf16 VPU path; result is
            # already bf16 for the next MXU pass.
            return jnp.maximum(acc.astype(jnp.bfloat16) + b_ref[...], 0)
        # v5e: f32 epilogue, single cast before the next MXU pass.
        return jnp.maximum(acc + b_ref[...], 0.0).astype(jnp.bfloat16)

    h = hidden(x_ref[...].astype(jnp.bfloat16), w1_ref, b1_ref)   # fc1 + relu
    h = hidden(h, w2_ref, b2_ref)                                 # fc2 + relu
    h = hidden(h, w3_ref, b3_ref)                                 # fc3 + relu
    acc = jnp.dot(h, w4_ref[...], preferred_element_type=jnp.float32)  # fc4
    # bf16 writeback (lane-dense 128-wide tile) halves the output HBM stream.
    o_ref[...] = (acc + b4_ref[...]).astype(o_ref.dtype)


def dqn_forward(x, packed_params, action_size, *, bf16_epilogue):
    """x: [B, state_size] f32. packed_params: list of (W_bf16 [in,out], b [1,out]);
    last layer padded to OUT_PAD lanes. Returns [B, action_size] f32 Q-values."""
    B, S = x.shape
    out_pad = packed_params[-1][0].shape[1]

    tile_b, b_pad, num_tiles = _choose_tiling(B)
    if b_pad != B:
        x = jnp.pad(x, ((0, b_pad - B), (0, 0)))

    flat_args = [x]
    # Activations: tiled over the batch grid axis (double-buffered by Pallas).
    in_specs = [pl.BlockSpec((tile_b, S), lambda i: (i, 0))]
    # Weights/biases: constant index_map keeps them VMEM-resident across grid
    # steps; Buffered(1) drops the dead second buffer.
    for (w, b) in packed_params:
        flat_args.extend([w, b])
        in_specs.append(pl.BlockSpec(w.shape, lambda i: (0, 0),
                                     pipeline_mode=pl.Buffered(1)))
        in_specs.append(pl.BlockSpec(b.shape, lambda i: (0, 0),
                                     pipeline_mode=pl.Buffered(1)))

    out_specs = pl.BlockSpec((tile_b, out_pad), lambda i: (i, 0))

    weight_bytes = sum(w.size * w.dtype.itemsize + b.size * b.dtype.itemsize
                       for (w, b) in packed_params)
    flops = 2 * b_pad * (S * HIDDEN + 2 * HIDDEN * HIDDEN + HIDDEN * out_pad)
    bytes_accessed = (x.size * x.dtype.itemsize
                      + weight_bytes
                      + b_pad * out_pad * 2)   # bf16 output writeback

    out = pl.pallas_call(
        functools.partial(dqn_kernel, bf16_epilogue=bf16_epilogue),
        out_shape=jax.ShapeDtypeStruct((b_pad, out_pad), jnp.bfloat16),
        grid=(num_tiles,),
        in_specs=in_specs,
        out_specs=out_specs,
        compiler_params=pltpu.CompilerParams(
            dimension_semantics=("parallel",),   # shard batch across v7x's 2 TCs
            vmem_limit_bytes=32 * 1024 * 1024,
        ),
        cost_estimate=pl.CostEstimate(
            flops=flops, transcendentals=0, bytes_accessed=bytes_accessed),
    )(*flat_args)

    # TODO(synk): for the tiny-batch acting path (B~8) the ~340 KB weight DMA
    # dominates; batch online+target-net evaluations into one call (or keep
    # weights VMEM-resident across calls via cross-call semaphore/VMEM futures)
    # to amortize it -- not done here to keep the script self-contained.

    # Strip batch padding and lane padding back to the logical action size.
    return out[:B, :action_size].astype(jnp.float32)


def init_params(key, state_size, action_size):
    """PyTorch-style Linear init: U(-1/sqrt(fan_in), 1/sqrt(fan_in)).
    Returns f32 params in logical shapes, W stored [in, out]."""
    sizes = [(state_size, HIDDEN), (HIDDEN, HIDDEN), (HIDDEN, HIDDEN),
             (HIDDEN, action_size)]
    params = []
    for (fan_in, fan_out) in sizes:
        key, kw, kb = jax.random.split(key, 3)
        bound = 1.0 / (fan_in ** 0.5)
        w = jax.random.uniform(kw, (fan_in, fan_out), jnp.float32, -bound, bound)
        b = jax.random.uniform(kb, (1, fan_out), jnp.float32, -bound, bound)
        params.append((w, b))
    return params


def pack_params(params, *, bf16_epilogue, out_pad=OUT_PAD):
    """Pad fc4 to out_pad lanes (zero columns), cast weights to bf16.
    Hidden-layer biases are bf16 when the bf16 epilogue is enabled (v6e/v7x);
    the final bias stays f32 (added in the f32 accumulator before the bf16
    output cast)."""
    packed = []
    last = len(params) - 1
    for i, (w, b) in enumerate(params):
        if i == last and w.shape[1] < out_pad:
            w = jnp.pad(w, ((0, 0), (0, out_pad - w.shape[1])))
            b = jnp.pad(b, ((0, 0), (0, out_pad - b.shape[1])))
        b_dtype = jnp.bfloat16 if (bf16_epilogue and i != last) else jnp.float32
        packed.append((w.astype(jnp.bfloat16), b.astype(b_dtype)))
    return packed


def reference_forward(x, params):
    h = x
    for i, (w, b) in enumerate(params):
        h = h @ w + b
        if i < len(params) - 1:
            h = jnp.maximum(h, 0.0)
    return h


if __name__ == "__main__":
    key = jax.random.PRNGKey(0)
    k_x, k_p = jax.random.split(key)

    batch = 8
    state_size = 16
    action_size = 8

    x = jax.random.normal(k_x, (batch, state_size), jnp.float32)
    params_f32 = init_params(k_p, state_size, action_size)

    bf16_ep = default_bf16_epilogue()
    packed = pack_params(params_f32, bf16_epilogue=bf16_ep)

    out = dqn_forward(x, packed, action_size, bf16_epilogue=bf16_ep)
    out = jax.block_until_ready(out)

    ref = reference_forward(x, params_f32)
    assert out.shape == (batch, action_size), out.shape
    # bf16 weights/activations/output with f32 MXU accumulation: validate
    # against the f32 PyTorch-equivalent reference at bf16 tolerance.
    assert jnp.allclose(out, ref, atol=5e-2, rtol=5e-2), \
        "mismatch vs f32 reference beyond bf16 tolerance"

    print("KERNEL_OK")
</pallas_src>

<mosaic_0001>
module attributes {stable_mosaic.version = 11 : i64} {
  func.func @dqn_kernel(%arg0: i32, %arg1: memref<16x16xf32, #tpu.memory_space<vmem>>, %arg2: memref<16x256xbf16, #tpu.memory_space<vmem>>, %arg3: memref<1x256xbf16, #tpu.memory_space<vmem>>, %arg4: memref<256x256xbf16, #tpu.memory_space<vmem>>, %arg5: memref<1x256xbf16, #tpu.memory_space<vmem>>, %arg6: memref<256x256xbf16, #tpu.memory_space<vmem>>, %arg7: memref<1x256xbf16, #tpu.memory_space<vmem>>, %arg8: memref<256x128xbf16, #tpu.memory_space<vmem>>, %arg9: memref<1x128xf32, #tpu.memory_space<vmem>>, %arg10: memref<16x128xbf16, #tpu.memory_space<vmem>>) attributes {dimension_semantics = [#tpu.dimension_semantics<parallel>], iteration_bounds = array<i64: 1>, scalar_prefetch = 0 : i64, scratch_operands = 0 : i64, tpu.core_type = #tpu.core_type<tc>, window_params = [{transform_indices = @transform_0, window_bounds = array<i64: 16, 16>}, {pipeline_mode = #tpu.pipeline_mode<synchronous>, transform_indices = @transform_1, window_bounds = array<i64: 16, 256>}, {pipeline_mode = #tpu.pipeline_mode<synchronous>, transform_indices = @transform_2, window_bounds = array<i64: 1, 256>}, {pipeline_mode = #tpu.pipeline_mode<synchronous>, transform_indices = @transform_3, window_bounds = array<i64: 256, 256>}, {pipeline_mode = #tpu.pipeline_mode<synchronous>, transform_indices = @transform_4, window_bounds = array<i64: 1, 256>}, {pipeline_mode = #tpu.pipeline_mode<synchronous>, transform_indices = @transform_5, window_bounds = array<i64: 256, 256>}, {pipeline_mode = #tpu.pipeline_mode<synchronous>, transform_indices = @transform_6, window_bounds = array<i64: 1, 256>}, {pipeline_mode = #tpu.pipeline_mode<synchronous>, transform_indices = @transform_7, window_bounds = array<i64: 256, 128>}, {pipeline_mode = #tpu.pipeline_mode<synchronous>, transform_indices = @transform_8, window_bounds = array<i64: 1, 128>}, {transform_indices = @transform_9, window_bounds = array<i64: 16, 128>}]} {
    %c0 = arith.constant 0 : index
    %c0_0 = arith.constant 0 : index
    %0 = vector.load %arg1[%c0, %c0_0] : memref<16x16xf32, #tpu.memory_space<vmem>>, vector<16x16xf32>
    %1 = arith.truncf %0 : vector<16x16xf32> to vector<16x16xbf16>
    %c0_1 = arith.constant 0 : index
    %c0_2 = arith.constant 0 : index
    %2 = vector.load %arg2[%c0_1, %c0_2] : memref<16x256xbf16, #tpu.memory_space<vmem>>, vector<16x256xbf16>
    %cst = arith.constant dense<0.000000e+00> : vector<16x256xf32>
    %3 = tpu.matmul %1, %2, %cst {dimension_numbers = #tpu.dot_dimension_numbers<[1], [0], [0], [1], [0, 0, 1, 1], [], []>} : vector<16x16xbf16>, vector<16x256xbf16>, vector<16x256xf32> -> vector<16x256xf32>
    %4 = arith.truncf %3 : vector<16x256xf32> to vector<16x256xbf16>
    %c0_3 = arith.constant 0 : index
    %c0_4 = arith.constant 0 : index
    %5 = vector.load %arg3[%c0_3, %c0_4] : memref<1x256xbf16, #tpu.memory_space<vmem>>, vector<1x256xbf16>
    %6 = vector.broadcast %5 : vector<1x256xbf16> to vector<16x256xbf16>
    %7 = arith.addf %4, %6 : vector<16x256xbf16>
    %cst_5 = arith.constant 0.000000e+00 : bf16
    %8 = vector.broadcast %cst_5 : bf16 to vector<16x256xbf16>
    %9 = arith.maximumf %7, %8 : vector<16x256xbf16>
    %c0_6 = arith.constant 0 : index
    %c0_7 = arith.constant 0 : index
    %10 = vector.load %arg4[%c0_6, %c0_7] : memref<256x256xbf16, #tpu.memory_space<vmem>>, vector<256x256xbf16>
    %cst_8 = arith.constant dense<0.000000e+00> : vector<16x256xf32>
    %11 = tpu.matmul %9, %10, %cst_8 {dimension_numbers = #tpu.dot_dimension_numbers<[1], [0], [0], [1], [0, 0, 1, 1], [], []>} : vector<16x256xbf16>, vector<256x256xbf16>, vector<16x256xf32> -> vector<16x256xf32>
    %12 = arith.truncf %11 : vector<16x256xf32> to vector<16x256xbf16>
    %c0_9 = arith.constant 0 : index
    %c0_10 = arith.constant 0 : index
    %13 = vector.load %arg5[%c0_9, %c0_10] : memref<1x256xbf16, #tpu.memory_space<vmem>>, vector<1x256xbf16>
    %14 = vector.broadcast %13 : vector<1x256xbf16> to vector<16x256xbf16>
    %15 = arith.addf %12, %14 : vector<16x256xbf16>
    %cst_11 = arith.constant 0.000000e+00 : bf16
    %16 = vector.broadcast %cst_11 : bf16 to vector<16x256xbf16>
    %17 = arith.maximumf %15, %16 : vector<16x256xbf16>
    %c0_12 = arith.constant 0 : index
    %c0_13 = arith.constant 0 : index
    %18 = vector.load %arg6[%c0_12, %c0_13] : memref<256x256xbf16, #tpu.memory_space<vmem>>, vector<256x256xbf16>
    %cst_14 = arith.constant dense<0.000000e+00> : vector<16x256xf32>
    %19 = tpu.matmul %17, %18, %cst_14 {dimension_numbers = #tpu.dot_dimension_numbers<[1], [0], [0], [1], [0, 0, 1, 1], [], []>} : vector<16x256xbf16>, vector<256x256xbf16>, vector<16x256xf32> -> vector<16x256xf32>
    %20 = arith.truncf %19 : vector<16x256xf32> to vector<16x256xbf16>
    %c0_15 = arith.constant 0 : index
    %c0_16 = arith.constant 0 : index
    %21 = vector.load %arg7[%c0_15, %c0_16] : memref<1x256xbf16, #tpu.memory_space<vmem>>, vector<1x256xbf16>
    %22 = vector.broadcast %21 : vector<1x256xbf16> to vector<16x256xbf16>
    %23 = arith.addf %20, %22 : vector<16x256xbf16>
    %cst_17 = arith.constant 0.000000e+00 : bf16
    %24 = vector.broadcast %cst_17 : bf16 to vector<16x256xbf16>
    %25 = arith.maximumf %23, %24 : vector<16x256xbf16>
    %c0_18 = arith.constant 0 : index
    %c0_19 = arith.constant 0 : index
    %26 = vector.load %arg8[%c0_18, %c0_19] : memref<256x128xbf16, #tpu.memory_space<vmem>>, vector<256x128xbf16>
    %cst_20 = arith.constant dense<0.000000e+00> : vector<16x128xf32>
    %27 = tpu.matmul %25, %26, %cst_20 {dimension_numbers = #tpu.dot_dimension_numbers<[1], [0], [0], [1], [0, 0, 1, 1], [], []>} : vector<16x256xbf16>, vector<256x128xbf16>, vector<16x128xf32> -> vector<16x128xf32>
    %c0_21 = arith.constant 0 : index
    %c0_22 = arith.constant 0 : index
    %28 = vector.load %arg9[%c0_21, %c0_22] : memref<1x128xf32, #tpu.memory_space<vmem>>, vector<1x128xf32>
    %29 = vector.broadcast %28 : vector<1x128xf32> to vector<16x128xf32>
    %30 = arith.addf %27, %29 : vector<16x128xf32>
    %31 = arith.truncf %30 : vector<16x128xf32> to vector<16x128xbf16>
    %c0_23 = arith.constant 0 : index
    %c0_24 = arith.constant 0 : index
    %32 = vector.load %arg10[%c0_23, %c0_24] : memref<16x128xbf16, #tpu.memory_space<vmem>>, vector<16x128xbf16>
    tpu.vector_store %arg10[%c0_23, %c0_24], %31 {strides = array<i32>} : memref<16x128xbf16, #tpu.memory_space<vmem>>, vector<16x128xbf16>,
    return
  }
  func.func @transform_0(%arg0: i32) -> (i32, i32) {
    %c0_i32 = arith.constant 0 : i32
    %c0_i32_0 = arith.constant 0 : i32
    return %arg0, %c0_i32 : i32, i32
  }
  func.func @transform_1(%arg0: i32) -> (i32, i32) {
    %c0_i32 = arith.constant 0 : i32
    %c0_i32_0 = arith.constant 0 : i32
    %c0_i32_1 = arith.constant 0 : i32
    return %c0_i32, %c0_i32_0 : i32, i32
  }
  func.func @transform_2(%arg0: i32) -> (i32, i32) {
    %c0_i32 = arith.constant 0 : i32
    %c0_i32_0 = arith.constant 0 : i32
    %c0_i32_1 = arith.constant 0 : i32
    return %c0_i32, %c0_i32_0 : i32, i32
  }
  func.func @transform_3(%arg0: i32) -> (i32, i32) {
    %c0_i32 = arith.constant 0 : i32
    %c0_i32_0 = arith.constant 0 : i32
    %c0_i32_1 = arith.constant 0 : i32
    return %c0_i32, %c0_i32_0 : i32, i32
  }
  func.func @transform_4(%arg0: i32) -> (i32, i32) {
    %c0_i32 = arith.constant 0 : i32
    %c0_i32_0 = arith.constant 0 : i32
    %c0_i32_1 = arith.constant 0 : i32
    return %c0_i32, %c0_i32_0 : i32, i32
  }
  func.func @transform_5(%arg0: i32) -> (i32, i32) {
    %c0_i32 = arith.constant 0 : i32
    %c0_i32_0 = arith.constant 0 : i32
    %c0_i32_1 = arith.constant 0 : i32
    return %c0_i32, %c0_i32_0 : i32, i32
  }
  func.func @transform_6(%arg0: i32) -> (i32, i32) {
    %c0_i32 = arith.constant 0 : i32
    %c0_i32_0 = arith.constant 0 : i32
    %c0_i32_1 = arith.constant 0 : i32
    return %c0_i32, %c0_i32_0 : i32, i32
  }
  func.func @transform_7(%arg0: i32) -> (i32, i32) {
    %c0_i32 = arith.constant 0 : i32
    %c0_i32_0 = arith.constant 0 : i32
    %c0_i32_1 = arith.constant 0 : i32
    return %c0_i32, %c0_i32_0 : i32, i32
  }
  func.func @transform_8(%arg0: i32) -> (i32, i32) {
    %c0_i32 = arith.constant 0 : i32
    %c0_i32_0 = arith.constant 0 : i32
    %c0_i32_1 = arith.constant 0 : i32
    return %c0_i32, %c0_i32_0 : i32, i32
  }
  func.func @transform_9(%arg0: i32) -> (i32, i32) {
    %c0_i32 = arith.constant 0 : i32
    %c0_i32_0 = arith.constant 0 : i32
    return %arg0, %c0_i32 : i32, i32
  }
}

</mosaic_0001>

<bundles_post_ra>
// kernel: tpu_custom_call.1
= control target key start
LH: loop header
LB: loop body
LE: loop exit
PB: predicated region body
PF: predicated region fallthrough
CT: control target
= control target key end

     0   :  { %14 = vsyncpa [#allocation3], 0  ;;  %s1678_s0 = inlined_call_operand.hbm [shape: f32[16,16], index: 0, kind: input, shape index: {}]   ;;  %s1679_s1 = inlined_call_operand.hbm [shape: bf16[16,256], index: 1, kind: input, shape index: {}]   ;;  %s1680_s2 = inlined_call_operand.hbm [shape: bf16[1,256], index: 2, kind: input, shape index: {}]   ;;  %s1681_s3 = inlined_call_operand.hbm [shape: bf16[256,256], index: 3, kind: input, shape index: {}]   ;;  %s1682_s4 = inlined_call_operand.vmem [shape: bf16[1,256], index: 4, kind: input, shape index: {}]   ;;  %s1683_s5 = inlined_call_operand.hbm [shape: bf16[256,256], index: 5, kind: input, shape index: {}]   ;;  %s1684_s6 = inlined_call_operand.vmem [shape: bf16[1,256], index: 6, kind: input, shape index: {}]   ;;  %s1685_s7 = inlined_call_operand.hbm [shape: bf16[256,128], index: 7, kind: input, shape index: {}]   ;;  %s1686_s8 = inlined_call_operand.vmem [shape: f32[1,128], index: 8, kind: input, shape index: {}]   ;;  %s1687_s9 = inlined_call_operand.hbm [shape: bf16[16,128], index: 9, kind: output, shape index: {}]  }
   0x1   :  { %15 = vsyncpa [#allocation6], 0 }
   0x2   :  { %16 = vsyncpa [#allocation9], 0 }
   0x3   :  { %17 = vsyncpa [#allocation12], 0 }
   0x4   :  { %18 = vsyncpa [#allocation4], 0  ;;  %s36_s11 = sshll.u32 %s1679_s1, 4  ;;  %s1567_s12 = smov [#allocation5]   ;;  %s37_s11 = int_to_ptr.hbm [resolvable:$true] %s36_s11 }
   0x5   :  { %s38_s13 = sshll.u32 %s1567_s12, 4  ;;  %s60_s16 = sshll.u32 %s1681_s3, 4  ;;  %s39_s13 = int_to_ptr.vmem [resolvable:$true] %s38_s13  ;;  %s61_s16 = int_to_ptr.hbm [resolvable:$true] %s60_s16 }
   0x6   :  { %s1568_s17 = smov 128   ;;  %s1569_s18 = smov 8  }
   0x7   :  { %44 = dma.hbm_to_vmem [thread:$0]  %s37_s11, 256, %s39_s13, [#allocation6], %s1568_s17, %s1568_s17, %s1569_s18  }
   0x8   :  { %s1570_s19 = smov [#allocation8]   ;;  %s23_s1 = sshll.u32 %s1678_s0, 4  ;;  %s24_s1 = int_to_ptr.hbm [resolvable:$true] %s23_s1 }
   0x9   :  { %s62_s20 = sshll.u32 %s1570_s19, 4  ;;  %s50_s24 = sshll.u32 %s1680_s2, 4  ;;  %s63_s20 = int_to_ptr.vmem [resolvable:$true] %s62_s20  ;;  %s51_s24 = int_to_ptr.hbm [resolvable:$true] %s50_s24 }
   0xa   :  { %68 = dma.hbm_to_vmem [thread:$0]  %s61_s16, 4096, %s63_s20, [#allocation9], %s1568_s17, %s1568_s17, %s1569_s18  }
   0xb   :  { %s1571_s25 = smov [#allocation2]   ;;  %s1572_s27 = smov [#allocation7]  }
   0xc   :  { %s25_s26 = sshll.u32 %s1571_s25, 4  ;;  %s52_s0 = sshll.u32 %s1572_s27, 4  ;;  %s26_s26 = int_to_ptr.vmem [resolvable:$true] %s25_s26  ;;  %s53_s0 = int_to_ptr.vmem [resolvable:$true] %s52_s0 }
   0xd   :  { %31 = dma.hbm_to_vmem [thread:$0]  %s24_s1, 256, %s26_s26, [#allocation3], %s1568_s17, %s1568_s17, %s1569_s18  }
   0xe   :  { %s75_s30 = sshll.u32 %s1683_s5, 4  ;;  %s90_s2 = sshll.u32 %s1685_s7, 4  ;;  %s76_s30 = int_to_ptr.hbm [resolvable:$true] %s75_s30  ;;  %s91_s2 = int_to_ptr.hbm [resolvable:$true] %s90_s2 }
   0xf   :  { %55 = dma.hbm_to_vmem [thread:$0]  %s51_s24, 32, %s53_s0, [#allocation6]  }
  0x10   :  { %s1573_s12 = smov [#allocation10]   ;;  %s1574_s14 = smov [#allocation11]  }
  0x11   :  { %s77_s13 = sshll.u32 %s1573_s12, 4  ;;  %s92_s15 = sshll.u32 %s1574_s14, 4  ;;  %s78_s13 = int_to_ptr.vmem [resolvable:$true] %s77_s13  ;;  %s93_s15 = int_to_ptr.vmem [resolvable:$true] %s92_s15 }
  0x12   :  { %83 = dma.hbm_to_vmem [thread:$0]  %s76_s30, 4096, %s78_s13, [#allocation9], %s1568_s17, %s1568_s17, %s1569_s18  }
  0x13   :  { %s1575_s16 = smov 64   ;;  %s1576_s5 = smov 4  }
  0x14   :  { %98 = dma.hbm_to_vmem [thread:$0]  %s91_s2, 2048, %s93_s15, [#allocation12], %s1575_s16, %s1575_s16, %s1576_s5  }
  0x15   :  { %1557 = dma.done.wait [#allocation3], 256  }
  0x16   :  { %1558 = vsyncadd [#allocation3], 4294967040 }
  0x17   :  { %1559 = dma.done.wait [#allocation6], 288  }
  0x18   :  { %1560 = vsyncadd [#allocation6], 4294967008 }
  0x19   :  { %1561 = dma.done.wait [#allocation9], 8192  }
  0x1a   :  { %1562 = vsyncadd [#allocation9], 4294959104 }
  0x1b   :  { %1563 = dma.done.wait [#allocation12], 2048  }
  0x1c   :  { %1564 = vsyncadd [#allocation12], 4294965248  ;;  %v962_v0 = vld [vmem:[#allocation5] sm:$0xf]  ;;  %v1291_v1 = vld [vmem:[#allocation5 + $0x4] sm:$0xf0] }
  0x1d   :  { %v1290_v2 = vld [vmem:[#allocation5 + $0x4] sm:$0xf]  ;;  %v963_v3 = vor.u32 %v1291_v1, %v962_v0  ;;  %v964_v4 = vld [vmem:[#allocation5 + $0x8] sm:$0xf0]  ;;  %v126_v5 = vld [vmem:[#allocation2] sm:$0xff]  ;;  %vm141_vm0 = vcmask 130048  }
  0x1e   :  { %v127_v6 = vld [vmem:[#allocation2 + $0x8] sm:$0xff]  ;;  %v967_v7 = vor.u32 %v1290_v2, %v964_v4  ;;  %v1028_v9 = vld [vmem:[#allocation8 + $0x70] sm:$0xf]  ;;  %v1307_v10 = vld [vmem:[#allocation8 + $0x74] sm:$0xf0]  ;;  %s1577_s20 = smov [#allocation13]  }
  0x1f   :  { %v128_v8 = vpack.c.bf16 %v127_v6, %v126_v5  ;;  %v1092_v11 = vld [vmem:[#allocation8 + $0xf0] sm:$0xf]  ;;  %152 = vmatpush.bf16.msra.mxu0 %v963_v3  ;;  %v1029_v12 = vor.u32 %v1307_v10, %v1028_v9  ;;  %v1323_v13 = vld [vmem:[#allocation8 + $0xf4] sm:$0xf0]  ;;  %v1306_v14 = vld [vmem:[#allocation8 + $0x74] sm:$0xf] }
  0x20   :  { %v1030_v15 = vld [vmem:[#allocation8 + $0x78] sm:$0xf0]  ;;  %166 = vmatpush.bf16.msra.mxu1 %v967_v7  ;;  %v1093_v16 = vor.u32 %v1323_v13, %v1092_v11  ;;  %v1322_v18 = vld [vmem:[#allocation8 + $0xf4] sm:$0xf]  ;;  %v1020_v20 = vld [vmem:[#allocation8 + $0x60] sm:$0xf] }
  0x21   :  { %v1033_v17 = vor.u32 %v1306_v14, %v1030_v15  ;;  %v1094_v19 = vld [vmem:[#allocation8 + $0xf8] sm:$0xf0]  ;;  %400 = vmatpush.bf16.msra.mxu2 %v1029_v12  ;;  %v1305_v22 = vld [vmem:[#allocation8 + $0x64] sm:$0xf0]  ;;  %v1084_v23 = vld [vmem:[#allocation8 + $0xe0] sm:$0xf] }
  0x22   :  { %v1097_v21 = vor.u32 %v1322_v18, %v1094_v19  ;;  %v1321_v24 = vld [vmem:[#allocation8 + $0xe4] sm:$0xf0]  ;;  %968 = vmatmul.msk.bf16.vlgmr.msra.gmra.mxu0 %vm141_vm0, %v128_v8  ;;  %414 = vmatpush.bf16.msra.mxu3 %v1093_v16  ;;  %v1021_v25 = vor.u32 %v1305_v22, %v1020_v20  ;;  %v1304_v27 = vld [vmem:[#allocation8 + $0x64] sm:$0xf]  ;;  %v1022_v28 = vld [vmem:[#allocation8 + $0x68] sm:$0xf0] }
  0x23   :  { %v1085_v26 = vor.u32 %v1321_v24, %v1084_v23  ;;  %v1320_v29 = vld [vmem:[#allocation8 + $0xe4] sm:$0xf]  ;;  %969 = vmatmul.msk.bf16.vlgmr.msra.gmra.mxu1 %vm141_vm0, %v128_v8  ;;  %428 = vmatpush.bf16.msrb.mxu0 %v1033_v17  ;;  %v1025_v30 = vor.u32 %v1304_v27, %v1022_v28  ;;  %v1086_v31 = vld [vmem:[#allocation8 + $0xe8] sm:$0xf0]  ;;  %v1012_v32 = vld [vmem:[#allocation8 + $0x50] sm:$0xf] }
  0x24   :  { %v1303_v33 = vld [vmem:[#allocation8 + $0x54] sm:$0xf0]  ;;  %442 = vmatpush.bf16.msrb.mxu1 %v1097_v21  ;;  %v1089_v34 = vor.u32 %v1320_v29, %v1086_v31  ;;  %v1076_v35 = vld [vmem:[#allocation8 + $0xd0] sm:$0xf]  ;;  %v1302_v37 = vld [vmem:[#allocation8 + $0x54] sm:$0xf] }
  0x25   :  { %v1319_v36 = vld [vmem:[#allocation8 + $0xd4] sm:$0xf0]  ;;  %401 = vmatpush.bf16.msra.mxu2 %v1021_v25  ;;  %v1013_v38 = vor.u32 %v1303_v33, %v1012_v32  ;;  %v1014_v39 = vld [vmem:[#allocation8 + $0x58] sm:$0xf0]  ;;  %v1318_v40 = vld [vmem:[#allocation8 + $0xd4] sm:$0xf] }
  0x26   :  { %v1078_v41 = vld [vmem:[#allocation8 + $0xd8] sm:$0xf0]  ;;  %415 = vmatpush.bf16.msra.mxu3 %v1085_v26  ;;  %v1077_v42 = vor.u32 %v1319_v36, %v1076_v35  ;;  %v1017_v43 = vor.u32 %v1302_v37, %v1014_v39  ;;  %v1004_v46 = vld [vmem:[#allocation8 + $0x40] sm:$0xf]  ;;  %v1301_v47 = vld [vmem:[#allocation8 + $0x44] sm:$0xf0] }
  0x27   :  { %429 = vmatpush.bf16.msrb.mxu0 %v1025_v30  ;;  %v1081_v44 = vor.u32 %v1318_v40, %v1078_v41  ;;  %v175_v45 = vld [vmem:[#allocation7] sm:$0x3]  ;;  %v1068_v48 = vld [vmem:[#allocation8 + $0xc0] sm:$0xf]  ;;  %v1005_v49 = vor.u32 %v1301_v47, %v1004_v46  ;;  %v1317_v50 = vld [vmem:[#allocation8 + $0xc4] sm:$0xf0] }
  0x28   :  { %443 = vmatpush.bf16.msrb.mxu1 %v1089_v34  ;;  %177 = vst [vmem:[#allocation1] ss:$9 sm:$0xff] %v175_v45  ;;  %v1300_v51 = vld [vmem:[#allocation8 + $0x44] sm:$0xf]  ;;  %v1006_v52 = vld [vmem:[#allocation8 + $0x48] sm:$0xf0]  ;;  %v1069_v53 = vor.u32 %v1317_v50, %v1068_v48 }
  0x29   :  { %402 = vmatpush.bf16.msra.mxu2 %v1013_v38  ;;  %v1009_v54 = vor.u32 %v1300_v51, %v1006_v52  ;;  %v1316_v55 = vld [vmem:[#allocation8 + $0xc4] sm:$0xf]  ;;  %v1070_v56 = vld [vmem:[#allocation8 + $0xc8] sm:$0xf0]  ;;  %v996_v58 = vld [vmem:[#allocation8 + $0x30] sm:$0xf] }
  0x2a   :  { %416 = vmatpush.bf16.msra.mxu3 %v1077_v42  ;;  %v1073_v57 = vor.u32 %v1316_v55, %v1070_v56  ;;  %v1299_v59 = vld [vmem:[#allocation8 + $0x34] sm:$0xf0]  ;;  %v1060_v60 = vld [vmem:[#allocation8 + $0xb0] sm:$0xf]  ;;  %v1298_v63 = vld [vmem:[#allocation8 + $0x34] sm:$0xf] }
  0x2b   :  { %430 = vmatpush.bf16.msrb.mxu0 %v1017_v43  ;;  %v997_v61 = vor.u32 %v1299_v59, %v996_v58  ;;  %v1315_v62 = vld [vmem:[#allocation8 + $0xb4] sm:$0xf0]  ;;  %v998_v0 = vld [vmem:[#allocation8 + $0x38] sm:$0xf0]  ;;  %v1314_v3 = vld [vmem:[#allocation8 + $0xb4] sm:$0xf] }
  0x2c   :  { %444 = vmatpush.bf16.msrb.mxu1 %v1081_v44  ;;  %v1061_v1 = vor.u32 %v1315_v62, %v1060_v60  ;;  %v1001_v2 = vor.u32 %v1298_v63, %v998_v0  ;;  %v1062_v4 = vld [vmem:[#allocation8 + $0xb8] sm:$0xf0]  ;;  %v988_v6 = vld [vmem:[#allocation8 + $0x20] sm:$0xf]  ;;  %v1297_v7 = vld [vmem:[#allocation8 + $0x24] sm:$0xf0] }
  0x2d   :  { %403 = vmatpush.bf16.msra.mxu2 %v1005_v49  ;;  %v1065_v5 = vor.u32 %v1314_v3, %v1062_v4  ;;  %v1052_v8 = vld [vmem:[#allocation8 + $0xa0] sm:$0xf]  ;;  %v989_v9 = vor.u32 %v1297_v7, %v988_v6  ;;  %v1313_v10 = vld [vmem:[#allocation8 + $0xa4] sm:$0xf0]  ;;  %v1296_v11 = vld [vmem:[#allocation8 + $0x24] sm:$0xf] }
  0x2e   :  { %417 = vmatpush.bf16.msra.mxu3 %v1069_v53  ;;  %v990_v12 = vld [vmem:[#allocation8 + $0x28] sm:$0xf0]  ;;  %v1053_v13 = vor.u32 %v1313_v10, %v1052_v8  ;;  %v1312_v15 = vld [vmem:[#allocation8 + $0xa4] sm:$0xf]  ;;  %v980_v18 = vld [vmem:[#allocation8 + $0x10] sm:$0xf] }
  0x2f   :  { %431 = vmatpush.bf16.msrb.mxu0 %v1009_v54  ;;  %v993_v14 = vor.u32 %v1296_v11, %v990_v12  ;;  %v1054_v16 = vld [vmem:[#allocation8 + $0xa8] sm:$0xf0]  ;;  %v1295_v19 = vld [vmem:[#allocation8 + $0x14] sm:$0xf0]  ;;  %v1044_v20 = vld [vmem:[#allocation8 + $0x90] sm:$0xf] }
  0x30   :  { %445 = vmatpush.bf16.msrb.mxu1 %v1073_v57  ;;  %v1057_v17 = vor.u32 %v1312_v15, %v1054_v16  ;;  %v981_v21 = vor.u32 %v1295_v19, %v980_v18  ;;  %v1311_v22 = vld [vmem:[#allocation8 + $0x94] sm:$0xf0]  ;;  %v1294_v23 = vld [vmem:[#allocation8 + $0x14] sm:$0xf]  ;;  %v982_v24 = vld [vmem:[#allocation8 + $0x18] sm:$0xf0] }
  0x31   :  { %404 = vmatpush.bf16.msra.mxu2 %v997_v61  ;;  %v1045_v25 = vor.u32 %v1311_v22, %v1044_v20  ;;  %v985_v26 = vor.u32 %v1294_v23, %v982_v24  ;;  %v1310_v27 = vld [vmem:[#allocation8 + $0x94] sm:$0xf]  ;;  %v1046_v28 = vld [vmem:[#allocation8 + $0x98] sm:$0xf0]  ;;  %v972_v29 = vld [vmem:[#allocation8] sm:$0xf] }
  0x32   :  { %418 = vmatpush.bf16.msra.mxu3 %v1061_v1  ;;  %v1049_v30 = vor.u32 %v1310_v27, %v1046_v28  ;;  %v1293_v31 = vld [vmem:[#allocation8 + $0x4] sm:$0xf0]  ;;  %v1036_v32 = vld [vmem:[#allocation8 + $0x80] sm:$0xf]  ;;  %v1292_v36 = vld [vmem:[#allocation8 + $0x4] sm:$0xf] }
  0x33   :  { %432 = vmatpush.bf16.msrb.mxu0 %v1001_v2  ;;  %v1309_v33 = vld [vmem:[#allocation8 + $0x84] sm:$0xf0]  ;;  %v973_v34 = vor.u32 %v1293_v31, %v972_v29  ;;  %v974_v37 = vld [vmem:[#allocation8 + $0x8] sm:$0xf0]  ;;  %v1308_v38 = vld [vmem:[#allocation8 + $0x84] sm:$0xf] }
  0x34   :  { %446 = vmatpush.bf16.msrb.mxu1 %v1065_v5  ;;  %v1037_v35 = vor.u32 %v1309_v33, %v1036_v32  ;;  %v977_v39 = vor.u32 %v1292_v36, %v974_v37  ;;  %v1038_v40 = vld [vmem:[#allocation8 + $0x88] sm:$0xf0]  ;;  %v178_v42 = vld [vmem:[#allocation1] sm:$0xff]  ;;  %v179_v43 = vld [vmem:[#allocation1 + $0x9] sm:$0xff]  ;;  %s942_s21 = sshll.u32 %s1577_s20, 4  ;;  %s944_s3 = sshll.u32 %s1687_s9, 4  ;;  %s943_s21 = int_to_ptr.vmem [resolvable:$true] %s942_s21  ;;  %s945_s3 = int_to_ptr.hbm [resolvable:$true] %s944_s3 }
  0x35   :  { %405 = vmatpush.bf16.msra.mxu2 %v989_v9  ;;  %v1041_v41 = vor.u32 %v1308_v38, %v1038_v40  ;;  %v458_v44 = vld [vmem:[%s1682_s4] sm:$0x3]  ;;  %v1156_v45 = vld [vmem:[#allocation10 + $0x70] sm:$0xf]  ;;  %v1339_v46 = vld [vmem:[#allocation10 + $0x74] sm:$0xf0]  ;;  %v180_v58 = vpack.i.b16 %v178_v42, %v178_v42  ;;  %v183_v59 = vpack.i.b16 %v179_v43, %v179_v43 }
  0x36   :  { %419 = vmatpush.bf16.msra.mxu3 %v1053_v13  ;;  %460 = vst [vmem:[#allocation1] ss:$9 sm:$0xff] %v458_v44  ;;  %v1157_v47 = vor.u32 %v1339_v46, %v1156_v45  ;;  %v1220_v48 = vld [vmem:[#allocation10 + $0xf0] sm:$0xf]  ;;  %v1355_v49 = vld [vmem:[#allocation10 + $0xf4] sm:$0xf0] }
  0x37   :  { %433 = vmatpush.bf16.msrb.mxu0 %v993_v14  ;;  %v1338_v50 = vld [vmem:[#allocation10 + $0x74] sm:$0xf]  ;;  %v1221_v51 = vor.u32 %v1355_v49, %v1220_v48  ;;  %v1158_v52 = vld [vmem:[#allocation10 + $0x78] sm:$0xf0]  ;;  %v182_v62 = vperm.slane %v180_v58, 0  ;;  %v185_v63 = vperm.slane %v183_v59, 0 }
  0x38   :  { %447 = vmatpush.bf16.msrb.mxu1 %v1057_v17  ;;  %v1354_v53 = vld [vmem:[#allocation10 + $0xf4] sm:$0xf]  ;;  %v1222_v54 = vld [vmem:[#allocation10 + $0xf8] sm:$0xf0]  ;;  %v1161_v55 = vor.u32 %v1338_v50, %v1158_v52  ;;  %v1148_v19 = vld [vmem:[#allocation10 + $0x60] sm:$0xf] }
  0x39   :  { %406 = vmatpush.bf16.msra.mxu2 %v981_v21  ;;  %v1225_v56 = vor.u32 %v1354_v53, %v1222_v54  ;;  %v190_v3 = vunpack.c.l.bf16 %v182_v62  ;;  %v191_v4 = vunpack.c.l.bf16 %v185_v63  ;;  %v1337_v20 = vld [vmem:[#allocation10 + $0x64] sm:$0xf0]  ;;  %v1212_v21 = vld [vmem:[#allocation10 + $0xe0] sm:$0xf]  ;;  %v1336_v24 = vld [vmem:[#allocation10 + $0x64] sm:$0xf] }
  0x3a   :  { %420 = vmatpush.bf16.msra.mxu3 %v1045_v25  ;;  %v1149_v22 = vor.u32 %v1337_v20, %v1148_v19  ;;  %v1353_v23 = vld [vmem:[#allocation10 + $0xe4] sm:$0xf0]  ;;  %v1150_v25 = vld [vmem:[#allocation10 + $0x68] sm:$0xf0]  ;;  %v1352_v28 = vld [vmem:[#allocation10 + $0xe4] sm:$0xf] }
  0x3b   :  { %434 = vmatpush.bf16.msrb.mxu0 %v985_v26  ;;  %v1213_v26 = vor.u32 %v1353_v23, %v1212_v21  ;;  %v1153_v27 = vor.u32 %v1336_v24, %v1150_v25  ;;  %v1214_v29 = vld [vmem:[#allocation10 + $0xe8] sm:$0xf0]  ;;  %v1140_v31 = vld [vmem:[#allocation10 + $0x50] sm:$0xf]  ;;  %v1335_v32 = vld [vmem:[#allocation10 + $0x54] sm:$0xf0] }
  0x3c   :  { %448 = vmatpush.bf16.msrb.mxu1 %v1049_v30  ;;  %v1217_v30 = vor.u32 %v1352_v28, %v1214_v29  ;;  %v1204_v33 = vld [vmem:[#allocation10 + $0xd0] sm:$0xf]  ;;  %v1334_v36 = vld [vmem:[#allocation10 + $0x54] sm:$0xf]  ;;  %v1142_v37 = vld [vmem:[#allocation10 + $0x58] sm:$0xf0] }
  0x3d   :  { %407 = vmatpush.bf16.msra.mxu2 %v973_v34  ;;  %v1141_v34 = vor.u32 %v1335_v32, %v1140_v31  ;;  %v1350_v40 = vld [vmem:[#allocation10 + $0xd4] sm:$0xf]  ;;  %v1132_v43 = vld [vmem:[#allocation10 + $0x40] sm:$0xf]  ;;  %v1333_v44 = vld [vmem:[#allocation10 + $0x44] sm:$0xf0] }
  0x3e   :  { %421 = vmatpush.bf16.msra.mxu3 %v1037_v35  ;;  %v1351_v35 = vld [vmem:[#allocation10 + $0xd4] sm:$0xf0]  ;;  %v1196_v45 = vld [vmem:[#allocation10 + $0xc0] sm:$0xf]  ;;  %v1133_v46 = vor.u32 %v1333_v44, %v1132_v43  ;;  %v1332_v48 = vld [vmem:[#allocation10 + $0x44] sm:$0xf] }
  0x3f   :  { %435 = vmatpush.bf16.msrb.mxu0 %v977_v39  ;;  %v1205_v38 = vor.u32 %v1351_v35, %v1204_v33  ;;  %v1145_v39 = vor.u32 %v1334_v36, %v1142_v37  ;;  %v1134_v49 = vld [vmem:[#allocation10 + $0x48] sm:$0xf0]  ;;  %v1348_v52 = vld [vmem:[#allocation10 + $0xc4] sm:$0xf]  ;;  %v1347_v59 = vld [vmem:[#allocation10 + $0xb4] sm:$0xf0] }
  0x40   :  { %449 = vmatpush.bf16.msrb.mxu1 %v1041_v41  ;;  %v1206_v41 = vld [vmem:[#allocation10 + $0xd8] sm:$0xf0]  ;;  %v1198_v53 = vld [vmem:[#allocation10 + $0xc8] sm:$0xf0]  ;;  %v1343_v19 = vld [vmem:[#allocation10 + $0x94] sm:$0xf0] }
  0x41   :  { %683 = vmatpush.bf16.msrb.mxu2 %v1157_v47  ;;  %v1209_v42 = vor.u32 %v1350_v40, %v1206_v41  ;;  %v1349_v47 = vld [vmem:[#allocation10 + $0xc4] sm:$0xf0]  ;;  %v1201_v54 = vor.u32 %v1348_v52, %v1198_v53  ;;  %v1326_v20 = vld [vmem:[#allocation10 + $0x14] sm:$0xf]  ;;  %v1110_v21 = vld [vmem:[#allocation10 + $0x18] sm:$0xf0] }
  0x42   :  { %697 = vmatpush.bf16.msrb.mxu3 %v1221_v51  ;;  %v1197_v50 = vor.u32 %v1349_v47, %v1196_v45  ;;  %v1137_v51 = vor.u32 %v1332_v48, %v1134_v49  ;;  %v1113_v23 = vor.u32 %v1326_v20, %v1110_v21  ;;  %v1342_v24 = vld [vmem:[#allocation10 + $0x94] sm:$0xf]  ;;  %v1174_v25 = vld [vmem:[#allocation10 + $0x98] sm:$0xf0]  ;;  %v1325_v28 = vld [vmem:[#allocation10 + $0x4] sm:$0xf0] }
  0x43   :  { %711 = vmatpush.bf16.msra.mxu0 %v1161_v55  ;;  %v1124_v55 = vld [vmem:[#allocation10 + $0x30] sm:$0xf]  ;;  %v1164_v29 = vld [vmem:[#allocation10 + $0x80] sm:$0xf]  ;;  %v1324_v33 = vld [vmem:[#allocation10 + $0x4] sm:$0xf] }
  0x44   :  { %725 = vmatpush.bf16.msra.mxu1 %v1225_v56  ;;  %v1331_v56 = vld [vmem:[#allocation10 + $0x34] sm:$0xf0]  ;;  %v1340_v35 = vld [vmem:[#allocation10 + $0x84] sm:$0xf]  ;;  %v1166_v37 = vld [vmem:[#allocation10 + $0x88] sm:$0xf0] }
  0x45   :  { %684 = vmatpush.bf16.msrb.mxu2 %v1149_v22  ;;  %v1125_v58 = vor.u32 %v1331_v56, %v1124_v55  ;;  %v462_v40 = vld [vmem:[#allocation1 + $0x9] sm:$0xff]  ;;  %v741_v41 = vld [vmem:[%s1684_s6] sm:$0x3] }
  0x46   :  { %698 = vmatpush.bf16.msrb.mxu3 %v1213_v26  ;;  %v1100_v26 = vld [vmem:[#allocation10] sm:$0xf]  ;;  %v1371_v43 = vld [vmem:[#allocation11 + $0x78] sm:$0xff]  ;;  %v466_v49 = vpack.i.b16 %v462_v40, %v462_v40 }
  0x47   :  { %712 = vmatpush.bf16.msra.mxu0 %v1153_v27  ;;  %v1177_v27 = vor.u32 %v1342_v24, %v1174_v25  ;;  %v1101_v31 = vor.u32 %v1325_v28, %v1100_v26  ;;  %v1359_v20 = vld [vmem:[#allocation11 + $0x18] sm:$0xff]  ;;  %v1357_v24 = vld [vmem:[#allocation11 + $0x8] sm:$0xff]  ;;  %v1356_v26 = vld [vmem:[#allocation11] sm:$0xff] }
  0x48   :  { %726 = vmatpush.bf16.msra.mxu1 %v1217_v30  ;;  %v1341_v30 = vld [vmem:[#allocation10 + $0x84] sm:$0xf0]  ;;  %v468_v53 = vperm.slane %v466_v49, 0  ;;  %v1367_v21 = vld [vmem:[#allocation11 + $0x58] sm:$0xff] }
  0x49   :  { %685 = vmatpush.bf16.msrb.mxu2 %v1141_v34  ;;  %v1165_v32 = vor.u32 %v1341_v30, %v1164_v29  ;;  %v1102_v34 = vld [vmem:[#allocation10 + $0x8] sm:$0xf0] }
  0x4a   :  { %699 = vmatpush.bf16.msrb.mxu3 %v1205_v38  ;;  %v1105_v36 = vor.u32 %v1324_v33, %v1102_v34  ;;  %v1169_v38 = vor.u32 %v1340_v35, %v1166_v37  ;;  %v1365_v25 = vld [vmem:[#allocation11 + $0x48] sm:$0xff] }
  0x4b   :  { %713 = vmatpush.bf16.msra.mxu0 %v1145_v39  ;;  %v461_v39 = vld [vmem:[#allocation1] sm:$0xff] }
  0x4c   :  { %727 = vmatpush.bf16.msra.mxu1 %v1209_v42  ;;  %743 = vst [vmem:[#allocation1] ss:$9 sm:$0xff] %v741_v41  ;;  %v1363_v42 = vld [vmem:[#allocation11 + $0x38] sm:$0xff]  ;;  %v463_v48 = vpack.i.b16 %v461_v39, %v461_v39 }
  0x4d   :  { %686 = vmatpush.bf16.msrb.mxu2 %v1133_v46 }
  0x4e   :  { %700 = vmatpush.bf16.msrb.mxu3 %v1197_v50  ;;  %v465_v52 = vperm.slane %v463_v48, 0 }
  0x4f   :  { %714 = vmatpush.bf16.msra.mxu0 %v1137_v51 }
  0x50   :  { %728 = vmatpush.bf16.msra.mxu1 %v1201_v54 }
  0x51   :  { %687 = vmatpush.bf16.msrb.mxu2 %v1125_v58 }
  0x53   :  { %v744_v30 = vld [vmem:[#allocation1] sm:$0xff] }
  0x54   :  { %v746_v34 = vpack.i.b16 %v744_v30, %v744_v30 }
  0x9f   :  { %v154_v57 = vpop.f32.mrf.mxu0 }
  0xa0   :  { %v168_v60 = vpop.f32.mrf.mxu1 }
  0xa1   :  { %v173_v61 = vpack.c.bf16 %v168_v60, %v154_v57  ;;  %v1188_v57 = vld [vmem:[#allocation10 + $0xb0] sm:$0xf]  ;;  %v1330_v60 = vld [vmem:[#allocation10 + $0x34] sm:$0xf] }
  0xa2   :  { %v1189_v62 = vor.u32 %v1347_v59, %v1188_v57  ;;  %v473_v59 = vunpack.c.l.bf16 %v465_v52 }
  0xa3   :  { %v186_v0 = vunpack.c.l.bf16 %v173_v61  ;;  %v187_v1 = vunpack.c.h.bf16 %v173_v61  ;;  %v1126_v61 = vld [vmem:[#allocation10 + $0x38] sm:$0xf0] }
  0xa4   :  { %v1129_v63 = vor.u32 %v1330_v60, %v1126_v61  ;;  %701 = vmatpush.bf16.msrb.mxu3 %v1189_v62  ;;  %v474_v60 = vunpack.c.l.bf16 %v468_v53 }
  0xa5   :  { %v192_v9 = vadd.f32 %v190_v3, %v186_v0  ;;  %v193_v10 = vadd.f32 %v191_v4, %v187_v1  ;;  %v1346_v0 = vld [vmem:[#allocation10 + $0xb4] sm:$0xf]  ;;  %v1190_v1 = vld [vmem:[#allocation10 + $0xb8] sm:$0xf0] }
  0xa6   :  { %715 = vmatpush.bf16.msra.mxu0 %v1129_v63 }
  0xa7   :  { %v156_v2 = vpop.f32.mrf.mxu0  ;;  %v202_v13 = vmax.f32 %v192_v9, 0.0  ;;  %v203_v15 = vmax.f32 %v193_v10, 0.0  ;;  %v1118_v9 = vld [vmem:[#allocation10 + $0x28] sm:$0xf0] }
  0xa8   :  { %v170_v5 = vpop.f32.mrf.mxu1 }
  0xa9   :  { %v174_v6 = vpack.c.bf16 %v170_v5, %v156_v2  ;;  %v1193_v2 = vor.u32 %v1346_v0, %v1190_v1  ;;  %v1180_v5 = vld [vmem:[#allocation10 + $0xa0] sm:$0xf] }
  0xab   :  { %v188_v7 = vunpack.c.l.bf16 %v174_v6  ;;  %v189_v8 = vunpack.c.h.bf16 %v174_v6  ;;  %729 = vmatpush.bf16.msra.mxu1 %v1193_v2 }
  0xad   :  { %v194_v11 = vadd.f32 %v190_v3, %v188_v7  ;;  %v195_v12 = vadd.f32 %v191_v4, %v189_v8  ;;  %v1116_v3 = vld [vmem:[#allocation10 + $0x20] sm:$0xf]  ;;  %v1329_v4 = vld [vmem:[#allocation10 + $0x24] sm:$0xf0]  ;;  %v1328_v8 = vld [vmem:[#allocation10 + $0x24] sm:$0xf] }
  0xae   :  { %v1117_v6 = vor.u32 %v1329_v4, %v1116_v3  ;;  %v1345_v7 = vld [vmem:[#allocation10 + $0xa4] sm:$0xf0] }
  0xaf   :  { %v204_v14 = vmax.f32 %v194_v11, 0.0  ;;  %v205_v16 = vmax.f32 %v195_v12, 0.0  ;;  %v1181_v10 = vor.u32 %v1345_v7, %v1180_v5  ;;  %v1121_v11 = vor.u32 %v1328_v8, %v1118_v9  ;;  %v1344_v12 = vld [vmem:[#allocation10 + $0xa4] sm:$0xf] }
  0xb0   :  { %688 = vmatpush.bf16.msrb.mxu2 %v1117_v6 }
  0xb1   :  { %v206_v17 = vpack.c.bf16 %v204_v14, %v202_v13  ;;  %v207_v18 = vpack.c.bf16 %v205_v16, %v203_v15  ;;  %v1182_v13 = vld [vmem:[#allocation10 + $0xa8] sm:$0xf0]  ;;  %702 = vmatpush.bf16.msrb.mxu3 %v1181_v10  ;;  %716 = vmatpush.bf16.msra.mxu0 %v1121_v11  ;;  %v1108_v15 = vld [vmem:[#allocation10 + $0x10] sm:$0xf]  ;;  %v1327_v16 = vld [vmem:[#allocation10 + $0x14] sm:$0xf0] }
  0xb2   :  { %v1185_v14 = vor.u32 %v1344_v12, %v1182_v13 }
  0xb3   :  { %408 = vmatmul.bf16.vlgmr.msra.gmra.mxu2 %v206_v17  ;;  %422 = vmatmul.bf16.vlgmr.msra.gmra.mxu3 %v207_v18 }
  0xb4   :  { %436 = vmatmul.bf16.vlgmr.msrb.gmra.mxu0 %v206_v17  ;;  %450 = vmatmul.bf16.vlgmr.msrb.gmra.mxu1 %v207_v18  ;;  %v1172_v17 = vld [vmem:[#allocation10 + $0x90] sm:$0xf]  ;;  %v1109_v18 = vor.u32 %v1327_v16, %v1108_v15  ;;  %v1361_v16 = vld [vmem:[#allocation11 + $0x28] sm:$0xff] }
  0xb5   :  { %730 = vmatpush.bf16.msra.mxu1 %v1185_v14  ;;  %v1173_v22 = vor.u32 %v1343_v19, %v1172_v17  ;;  %717 = vmatpush.bf16.msra.mxu0 %v1113_v23  ;;  %v1362_v14 = vld [vmem:[#allocation11 + $0x30] sm:$0xff]  ;;  %v1369_v17 = vld [vmem:[#allocation11 + $0x68] sm:$0xff]  ;;  %v1368_v19 = vld [vmem:[#allocation11 + $0x60] sm:$0xff] }
  0xb6   :  { %689 = vmatpush.bf16.msrb.mxu2 %v1109_v18  ;;  %v1370_v15 = vld [vmem:[#allocation11 + $0x70] sm:$0xff]  ;;  %v1360_v18 = vld [vmem:[#allocation11 + $0x20] sm:$0xff] }
  0xb7   :  { %703 = vmatpush.bf16.msrb.mxu3 %v1173_v22  ;;  %v1358_v22 = vld [vmem:[#allocation11 + $0x10] sm:$0xff] }
  0xb8   :  { %v1366_v23 = vld [vmem:[#allocation11 + $0x50] sm:$0xff] }
  0xb9   :  { %731 = vmatpush.bf16.msra.mxu1 %v1177_v27  ;;  %718 = vmatpush.bf16.msra.mxu0 %v1105_v36  ;;  %v1364_v27 = vld [vmem:[#allocation11 + $0x40] sm:$0xff] }
  0xba   :  { %690 = vmatpush.bf16.msrb.mxu2 %v1101_v31  ;;  %v745_v31 = vld [vmem:[#allocation1 + $0x9] sm:$0xff] }
  0xbb   :  { %704 = vmatpush.bf16.msrb.mxu3 %v1165_v32  ;;  %v749_v35 = vpack.i.b16 %v745_v31, %v745_v31 }
  0xbd   :  { %732 = vmatpush.bf16.msra.mxu1 %v1169_v38  ;;  %v748_v38 = vperm.slane %v746_v34, 0  ;;  %v751_v39 = vperm.slane %v749_v35, 0 }
  0xbe   :  { %906 = vmatpush.bf16.msra.mxu2 %v1363_v42 }
  0xbf   :  { %920 = vmatpush.bf16.msra.mxu3 %v1371_v43  ;;  %v756_v43 = vunpack.c.l.bf16 %v748_v38 }
  0xc2   :  { %907 = vmatpush.bf16.msra.mxu2 %v1362_v14 }
  0xc3   :  { %921 = vmatpush.bf16.msra.mxu3 %v1370_v15 }
  0xc6   :  { %908 = vmatpush.bf16.msra.mxu2 %v1361_v16 }
  0xc7   :  { %922 = vmatpush.bf16.msra.mxu3 %v1369_v17 }
  0xca   :  { %909 = vmatpush.bf16.msra.mxu2 %v1360_v18 }
  0xcb   :  { %923 = vmatpush.bf16.msra.mxu3 %v1368_v19 }
  0xce   :  { %910 = vmatpush.bf16.msra.mxu2 %v1359_v20 }
  0xcf   :  { %924 = vmatpush.bf16.msra.mxu3 %v1367_v21 }
  0xd2   :  { %911 = vmatpush.bf16.msra.mxu2 %v1358_v22 }
  0xd3   :  { %925 = vmatpush.bf16.msra.mxu3 %v1366_v23 }
  0xd6   :  { %912 = vmatpush.bf16.msra.mxu2 %v1357_v24 }
  0xd7   :  { %926 = vmatpush.bf16.msra.mxu3 %v1365_v25 }
  0xda   :  { %913 = vmatpush.bf16.msra.mxu2 %v1356_v26 }
  0xdb   :  { %927 = vmatpush.bf16.msra.mxu3 %v1364_v27 }
 0x131   :  { %v437_v44 = vpop.f32.mrf.mxu0  ;;  %v451_v45 = vpop.f32.mrf.mxu1 }
 0x132   :  { %v452_v51 = vadd.f32 %v451_v45, %v437_v44  ;;  %v757_v44 = vunpack.c.l.bf16 %v751_v39 }
 0x136   :  { %v409_v46 = vpop.f32.mrf.mxu2  ;;  %v423_v47 = vpop.f32.mrf.mxu3 }
 0x137   :  { %v424_v50 = vadd.f32 %v423_v47, %v409_v46 }
 0x139   :  { %v456_v54 = vpack.c.bf16 %v452_v51, %v424_v50  ;;  %v439_v55 = vpop.f32.mrf.mxu0  ;;  %v453_v56 = vpop.f32.mrf.mxu1 }
 0x13a   :  { %v454_v63 = vadd.f32 %v453_v56, %v439_v55 }
 0x13b   :  { %v469_v61 = vunpack.c.l.bf16 %v456_v54  ;;  %v470_v62 = vunpack.c.h.bf16 %v456_v54 }
 0x13d   :  { %v475_v4 = vadd.f32 %v473_v59, %v469_v61  ;;  %v476_v5 = vadd.f32 %v474_v60, %v470_v62 }
 0x13e   :  { %v411_v57 = vpop.f32.mrf.mxu2  ;;  %v425_v58 = vpop.f32.mrf.mxu3 }
 0x13f   :  { %v426_v0 = vadd.f32 %v425_v58, %v411_v57  ;;  %v485_v8 = vmax.f32 %v475_v4, 0.0  ;;  %v486_v10 = vmax.f32 %v476_v5, 0.0 }
 0x141   :  { %v457_v1 = vpack.c.bf16 %v454_v63, %v426_v0 }
 0x143   :  { %v471_v2 = vunpack.c.l.bf16 %v457_v1  ;;  %v472_v3 = vunpack.c.h.bf16 %v457_v1 }
 0x145   :  { %v477_v6 = vadd.f32 %v473_v59, %v471_v2  ;;  %v478_v7 = vadd.f32 %v474_v60, %v472_v3  ;;  %v1388_v2 = vld [vmem:[%s1686_s8] ss:$0 sm:$0xff] }
 0x147   :  { %v487_v9 = vmax.f32 %v477_v6, 0.0  ;;  %v488_v11 = vmax.f32 %v478_v7, 0.0 }
 0x149   :  { %v489_v12 = vpack.c.bf16 %v487_v9, %v485_v8  ;;  %v490_v13 = vpack.c.bf16 %v488_v11, %v486_v10 }
 0x14b   :  { %691 = vmatmul.bf16.vlgmr.msrb.gmra.mxu2 %v489_v12  ;;  %705 = vmatmul.bf16.vlgmr.msrb.gmra.mxu3 %v490_v13 }
 0x14c   :  { %719 = vmatmul.bf16.vlgmr.msra.gmra.mxu0 %v489_v12  ;;  %733 = vmatmul.bf16.vlgmr.msra.gmra.mxu1 %v490_v13 }
 0x1c9   :  { %v720_v28 = vpop.f32.mrf.mxu0  ;;  %v734_v29 = vpop.f32.mrf.mxu1 }
 0x1ca   :  { %v735_v37 = vadd.f32 %v734_v29, %v720_v28 }
 0x1ce   :  { %v692_v32 = vpop.f32.mrf.mxu2  ;;  %v706_v33 = vpop.f32.mrf.mxu3 }
 0x1cf   :  { %v707_v36 = vadd.f32 %v706_v33, %v692_v32 }
 0x1d1   :  { %v739_v40 = vpack.c.bf16 %v735_v37, %v707_v36  ;;  %v722_v41 = vpop.f32.mrf.mxu0  ;;  %v736_v42 = vpop.f32.mrf.mxu1 }
 0x1d2   :  { %v737_v49 = vadd.f32 %v736_v42, %v722_v41 }
 0x1d3   :  { %v752_v47 = vunpack.c.l.bf16 %v739_v40  ;;  %v753_v48 = vunpack.c.h.bf16 %v739_v40 }
 0x1d5   :  { %v758_v52 = vadd.f32 %v756_v43, %v752_v47  ;;  %v759_v53 = vadd.f32 %v757_v44, %v753_v48 }
 0x1d6   :  { %v694_v45 = vpop.f32.mrf.mxu2  ;;  %v708_v46 = vpop.f32.mrf.mxu3 }
 0x1d7   :  { %v709_v50 = vadd.f32 %v708_v46, %v694_v45  ;;  %v768_v58 = vmax.f32 %v758_v52, 0.0  ;;  %v769_v59 = vmax.f32 %v759_v53, 0.0 }
 0x1d9   :  { %v740_v51 = vpack.c.bf16 %v737_v49, %v709_v50 }
 0x1db   :  { %v754_v54 = vunpack.c.l.bf16 %v740_v51  ;;  %v755_v55 = vunpack.c.h.bf16 %v740_v51 }
 0x1dd   :  { %v760_v56 = vadd.f32 %v756_v43, %v754_v54  ;;  %v761_v57 = vadd.f32 %v757_v44, %v755_v55 }
 0x1df   :  { %v770_v60 = vmax.f32 %v760_v56, 0.0  ;;  %v771_v61 = vmax.f32 %v761_v57, 0.0 }
 0x1e1   :  { %v772_v62 = vpack.c.bf16 %v770_v60, %v768_v58  ;;  %v773_v63 = vpack.c.bf16 %v771_v61, %v769_v59 }
 0x1e3   :  { %914 = vmatmul.bf16.vlgmr.msra.gmra.mxu2 %v772_v62  ;;  %928 = vmatmul.bf16.vlgmr.msra.gmra.mxu3 %v773_v63 }
 0x266   :  { %v915_v0 = vpop.f32.mrf.mxu2  ;;  %v929_v1 = vpop.f32.mrf.mxu3 }
 0x267   :  { %v916_v3 = vadd.f32 %v1388_v2, %v915_v0 }
 0x269   :  { %v930_v7 = vadd.f32 %v929_v1, %v916_v3 }
 0x26e   :  { %v917_v4 = vpop.f32.mrf.mxu2  ;;  %v931_v6 = vpop.f32.mrf.mxu3 }
 0x26f   :  { %v918_v5 = vadd.f32 %v1388_v2, %v917_v4 }
 0x271   :  { %v932_v8 = vadd.f32 %v931_v6, %v918_v5 }
 0x273   :  { %v1375_v9 = vpack.c.bf16 %v932_v8, %v930_v7 }
 0x275   :  { %1376 = vst [vmem:[#allocation13] sm:$0xff] %v1375_v9  }
 0x276   :  { %950 = dma.vmem_to_hbm [thread:$0]  %s943_s21, 128, %s945_s3, [#allocation4], %s1575_s16, %s1575_s16, %s1576_s5  }
 0x277   :  { %1565 = dma.done.wait [#allocation4], 128  }
 0x278   :  { %1566 = vsyncadd [#allocation4], 4294967168 }
 0x279   :  { %955 = vsyncpa [#allocation3], 1 }
 0x27a   :  { %956 = vsyncpa [#allocation6], 1 }
 0x27b   :  { %957 = vsyncpa [#allocation9], 1 }
 0x27c   :  { %958 = vsyncpa [#allocation12], 1 }
 0x27d   :  { %959 = vsyncpa [#allocation4], 1 }

</bundles_post_ra>
